<compile_context>
chip_gen: v7x
topology: tpu7x:2x2x1
jax: 0.10.0
libtpu: 0.0.40
codegen_flags: <defaults>
</compile_context>

<pallas_src>
import functools
import numpy as np

import jax
import jax.numpy as jnp
from jax import lax
from jax.experimental import pallas as pl
from jax.experimental.pallas import tpu as pltpu


def gla2_kernel(hs_ref, wq_ref, wk_ref, wog_ref, wig_ref, gnorm_ref, wo_ref,
                ltri_ref, out_ref, s_ref, o_buf, *, eps, num_slot, chunk, mxu_dtype):
    """One (batch, super-chunk) tile.

    hs_ref / out_ref : (S, H) with S = chunks_per_step * chunk (batch dim squeezed).
    s_ref            : (H, K) transposed recurrent state S^T, carried across the
                       super-chunk ("arbitrary") grid axis, reset at sc == 0.
    o_buf            : (S, H) f32 scratch for the pre-norm GLA output (replaces the
                       materializing concatenate and bounds per-sub-chunk live ranges).
    """
    sc = pl.program_id(1)

    # reset recurrent state at the start of every sequence (new batch element)
    @pl.when(sc == 0)
    def _():
        s_ref[...] = jnp.zeros_like(s_ref)

    S_len, H = hs_ref.shape
    C = chunk
    n_sub = S_len // C
    K = num_slot

    hs = hs_ref[...].astype(jnp.float32)                                   # (S, H); v = hidden_states
    hs_mx = hs.astype(mxu_dtype)

    # ---- q/k projections: mxu_dtype operands, f32 accumulation. Unfused so the q/k
    # split never sits on a non-128-aligned lane boundary when K < 128. ----
    q_logits = jnp.dot(hs_mx, wq_ref[...], preferred_element_type=jnp.float32)   # (S, K)
    k = jax.nn.sigmoid(jnp.dot(hs_mx, wk_ref[...], preferred_element_type=jnp.float32))
    # softmax over the slot axis (written out explicitly)
    q_logits = q_logits - jnp.max(q_logits, axis=-1, keepdims=True)
    q_e = jnp.exp(q_logits)
    q = q_e / jnp.sum(q_e, axis=-1, keepdims=True)
    # gf = logsigmoid(-k) = -log(1 + exp(k)); k in (0,1) so exp(k) in (1, e) and the
    # argument of log is never near 1+eps -> log1p buys nothing here.
    gf = -jnp.log(1.0 + jnp.exp(k))                                        # (S, K), all negative

    ltri = ltri_ref[...]                                                   # (C, C) lower-tri incl diag

    # ---- chunked GLA recurrence over n_sub sub-chunks ----
    for j in range(n_sub):                      # static trip count -> static, aligned slices
        sl = slice(j * C, (j + 1) * C)
        qj, kj, gj, vj = q[sl], k[sl], gf[sl], hs[sl]

        # intra-chunk cumulative log-gates via triangular matmul (cumsum-as-matmul).
        # Kept f32: bf16 error on G is amplified by exp() when |G| ~ C.
        G = jnp.dot(ltri, gj, preferred_element_type=jnp.float32)          # (C, K)
        eG = jnp.exp(G)
        emG = jnp.exp(-G)                        # computed once, reused for k_t and k_decay
        q_t = qj * eG
        k_t = kj * emG
        eG_last = eG[C - 1:C, :]                 # (1, K), broadcasts along lanes
        k_decay = k_t * eG_last                  # = k * exp(G_last - G) in (0, 1]

        # MXU operands in mxu_dtype (bf16 in production), f32 accumulation everywhere.
        q_mx = q_t.astype(mxu_dtype)
        k_mx = k_t.astype(mxu_dtype)
        v_mx = vj.astype(mxu_dtype)

        state = s_ref[...]                       # (H, K) == S^T, f32

        # intra-chunk attention: o[t] = sum_{s<=t} (q_t . exp(G_t - G_s) * k_s) v_s
        A = lax.dot_general(q_mx, k_mx, (((1,), (1,)), ((), ())),
                            preferred_element_type=jnp.float32)            # (C, C)
        A = A * ltri                                                       # causal mask (f32)
        o_j = jnp.dot(A.astype(mxu_dtype), v_mx,
                      preferred_element_type=jnp.float32)                  # (C, H)

        # inter-chunk contribution from carried state (state is S^T -> NT matmul)
        o_j = o_j + lax.dot_general(q_mx, state.astype(mxu_dtype),
                                    (((1,), (1,)), ((), ())),
                                    preferred_element_type=jnp.float32)

        # state update: S^T <- S^T * exp(G_last) + v^T @ (k * exp(G_last - G)).
        # Operands in mxu_dtype; the carried multiply-add stays f32.
        kvT = lax.dot_general(v_mx, k_decay.astype(mxu_dtype),
                              (((0,), (0,)), ((), ())),
                              preferred_element_type=jnp.float32)          # (H, K)
        s_ref[...] = state * eG_last + kvT
        o_buf[pl.ds(j * C, C), :] = o_j

    o = o_buf[...]                                                         # (S, H) f32

    # ---- output gate: o @ Wog + hs @ Wig as two dots summed in f32 (no (S, 2H) concat) ----
    go = jnp.dot(o.astype(mxu_dtype), wog_ref[...], preferred_element_type=jnp.float32)
    go = go + jnp.dot(hs_mx, wig_ref[...], preferred_element_type=jnp.float32)   # (S, H)

    # ---- fused RMSNorm-swish-gate + output projection ----
    var = jnp.mean(o * o, axis=-1, keepdims=True)
    o_n = o * lax.rsqrt(var + eps) * gnorm_ref[...]                        # RMSNorm(o) * weight
    gated = o_n * (go * jax.nn.sigmoid(go))                                # * swish(go)
    out = jnp.dot(gated.astype(mxu_dtype), wo_ref[...],
                  preferred_element_type=jnp.float32)
    out_ref[...] = out.astype(out_ref.dtype)


def gla2_forward(hs, params, *, chunk_size=64, chunks_per_step=4, eps=1e-5,
                 mxu_dtype=jnp.bfloat16, stream_dtype=None,
                 vmem_limit_bytes=48 * 1024 * 1024):
    """hidden_states (B, L, H) -> output (B, L, H). Weights are (in_features, out_features).

    Per-generation tuning:
      v7x : chunks_per_step <= 4 and vmem_limit_bytes <= ~56 MiB (64 MiB physical VMEM);
            per-chip batch should be >= 2 so both TensorCores get work (batch is the
            only 'parallel' grid axis).
      v6e : vmem_limit_bytes ~96-100 MiB, chunks_per_step 8-16 (128 MiB VMEM).
      v5e : as v6e, plus stream_dtype=jnp.bfloat16 to halve the streamed hs/out bytes.
    """
    B, L, H = hs.shape
    K = params["wq"].shape[1]

    C = min(chunk_size, L)
    assert L % C == 0, "sequence length must be divisible by the chunk size"
    assert C <= 64, "chunk_size > 64 overflows f32 exp (needs secondary chunking)"
    n_chunks = L // C
    n_sub = max(1, min(chunks_per_step, n_chunks))
    while n_chunks % n_sub:                      # largest divisor of n_chunks <= chunks_per_step
        n_sub -= 1
    S = n_sub * C
    n_super = n_chunks // n_sub

    if stream_dtype is not None:                 # optional bf16 streaming of hs / out (v5e)
        hs = hs.astype(stream_dtype)
    out_dtype = hs.dtype

    # weights in mxu_dtype (bf16) halve weight DMA bytes and double MXU throughput
    wq = params["wq"].astype(mxu_dtype)          # (H, K)
    wk = params["wk"].astype(mxu_dtype)          # (H, K)
    wog = params["wog"].astype(mxu_dtype)        # (H, H)
    wig = params["wig"].astype(mxu_dtype)        # (H, H)
    wo = params["wo"].astype(mxu_dtype)          # (H, H)
    gnorm = params["gnorm"].astype(jnp.float32)  # (1, H)
    # hoisted causal / cumsum operator (paid once; no per-step iota/compare/cast)
    ltri = jnp.asarray(np.tril(np.ones((C, C), np.float32)))               # (C, C)

    def const_spec(shape):
        """Constant (weight/mask) blocks: constant index_map + single buffer (no 2x VMEM)."""
        idx = lambda b, s: (0,) * len(shape)
        try:
            return pl.BlockSpec(shape, idx, pipeline_mode=pl.Buffered(1))
        except (TypeError, AttributeError):      # older Pallas without pipeline_mode
            return pl.BlockSpec(shape, idx)

    itemsize = jnp.dtype(out_dtype).itemsize
    w_bytes = sum(int(np.prod(w.shape)) * w.dtype.itemsize
                  for w in (wq, wk, wog, wig, wo, gnorm, ltri))
    cost = pl.CostEstimate(
        flops=int(4 * B * L * H * K                                   # q/k projections
                  + 2 * B * L * (2 * C * K + C * H + 2 * K * H)       # chunked recurrence
                  + 6 * B * L * H * H),                               # og + ig + o_proj
        transcendentals=int(B * L * (6 * K + H + 1)),
        bytes_accessed=int(2 * B * L * H * itemsize + w_bytes))

    kernel = functools.partial(gla2_kernel, eps=eps, num_slot=K, chunk=C,
                               mxu_dtype=mxu_dtype)
    return pl.pallas_call(
        kernel,
        out_shape=jax.ShapeDtypeStruct((B, L, H), out_dtype),
        grid_spec=pltpu.PrefetchScalarGridSpec(
            num_scalar_prefetch=0,
            grid=(B, n_super),                   # super-chunk axis is the sequential inner axis
            in_specs=[
                pl.BlockSpec((pl.Squeezed(), S, H), lambda b, s: (b, s, 0)),  # hidden_states
                const_spec((H, K)),              # Wq
                const_spec((H, K)),              # Wk
                const_spec((H, H)),              # Wog
                const_spec((H, H)),              # Wig
                const_spec((1, H)),              # RMSNorm weight
                const_spec((H, H)),              # Wo
                const_spec((C, C)),              # lower-triangular mask / cumsum operator
            ],
            out_specs=pl.BlockSpec((pl.Squeezed(), S, H), lambda b, s: (b, s, 0)),
            scratch_shapes=[
                pltpu.VMEM((H, K), jnp.float32),   # recurrent state S^T, carried across sc
                pltpu.VMEM((S, H), jnp.float32),   # pre-norm GLA output (replaces concatenate)
            ]),
        compiler_params=pltpu.CompilerParams(
            dimension_semantics=("parallel", "arbitrary"),
            vmem_limit_bytes=vmem_limit_bytes),
        cost_estimate=cost,
    )(hs, wq, wk, wog, wig, gnorm, wo, ltri)


def gla2_reference(hs, params, eps=1e-5):
    """Pure-JAX recurrent reference (matches fused_recurrent_gla semantics with scale=1)."""
    B, L, H = hs.shape
    K = params["wq"].shape[1]
    q = jax.nn.softmax(hs @ params["wq"], axis=-1)
    k = jax.nn.sigmoid(hs @ params["wk"])
    gf = -jnp.log(1.0 + jnp.exp(k))
    v = hs

    def run_one(qb, kb, vb, gb):
        def step(S, inp):
            q_t, k_t, v_t, g_t = inp
            S = S * jnp.exp(g_t)[:, None] + k_t[:, None] * v_t[None, :]
            return S, q_t @ S
        S0 = jnp.zeros((K, H), jnp.float32)
        _, o = lax.scan(step, S0, (qb, kb, vb, gb))
        return o

    o = jax.vmap(run_one)(q, k, v, gf)                                     # (B, L, H)
    go = o @ params["wog"] + hs @ params["wig"]
    var = jnp.mean(o * o, axis=-1, keepdims=True)
    o_n = o * lax.rsqrt(var + eps) * params["gnorm"][0]
    gated = o_n * (go * jax.nn.sigmoid(go))
    return gated @ params["wo"]


if __name__ == "__main__":
    # small config consistent with the module: hidden=32, heads=4 -> num_slot (key dim) = 8
    B, L, H, n_head = 2, 32, 32, 4
    K = H // n_head
    n_layer = 4
    std_in = 0.1
    std_out = std_in / np.sqrt(2 * n_layer)

    key = jax.random.PRNGKey(0)
    k0, k1, k2, k3, k4, k5 = jax.random.split(key, 6)
    params = {
        "wq": std_in * jax.random.normal(k0, (H, K), jnp.float32),   # q_proj.weight.T
        "wk": std_in * jax.random.normal(k1, (H, K), jnp.float32),   # k_proj.weight.T
        "wog": std_in * jax.random.normal(k2, (H, H), jnp.float32),  # og_proj.weight.T
        "wig": std_in * jax.random.normal(k3, (H, H), jnp.float32),  # ig_proj.weight.T
        "wo": std_out * jax.random.normal(k4, (H, H), jnp.float32),  # o_proj.weight.T
        "gnorm": jnp.ones((1, H), jnp.float32),                      # FusedRMSNormSwishGate weight
    }
    hidden_states = jax.random.normal(k5, (B, L, H), jnp.float32)

    ref = gla2_reference(hidden_states, params)

    # f32-MXU variant: tight check of the chunked algorithm / kernel plumbing
    out_f32 = gla2_forward(hidden_states, params, chunk_size=8, chunks_per_step=2,
                           mxu_dtype=jnp.float32)
    out_f32 = jax.block_until_ready(out_f32)
    np.testing.assert_allclose(np.asarray(out_f32), np.asarray(ref), rtol=1e-3, atol=1e-3)

    # bf16-MXU variant (projection + recurrence matmuls in bf16 with f32 accumulation)
    out_bf16 = gla2_forward(hidden_states, params, chunk_size=8, chunks_per_step=2)
    out_bf16 = jax.block_until_ready(out_bf16)
    np.testing.assert_allclose(np.asarray(out_bf16), np.asarray(ref), rtol=5e-2, atol=1e-2)

    # default-parameter path (single super-chunk per batch element, n_sub == 1)
    out_def = gla2_forward(hidden_states, params)
    out_def = jax.block_until_ready(out_def)
    np.testing.assert_allclose(np.asarray(out_def), np.asarray(ref), rtol=5e-2, atol=2e-2)

    # TODO(synk): short-convolution branch (config.use_short_conv=True), attention_mask padding
    # and KV-cache/recurrent-state output are not exercised (no single-kernel analogue here).
    print("KERNEL_OK")
</pallas_src>

<mosaic_0001>
module attributes {stable_mosaic.version = 11 : i64} {
  func.func @gla2_kernel(%arg0: i32, %arg1: i32, %arg2: memref<1x16x32xf32, #tpu.memory_space<vmem>>, %arg3: memref<32x8xf32, #tpu.memory_space<vmem>>, %arg4: memref<32x8xf32, #tpu.memory_space<vmem>>, %arg5: memref<32x32xf32, #tpu.memory_space<vmem>>, %arg6: memref<32x32xf32, #tpu.memory_space<vmem>>, %arg7: memref<1x32xf32, #tpu.memory_space<vmem>>, %arg8: memref<32x32xf32, #tpu.memory_space<vmem>>, %arg9: memref<8x8xf32, #tpu.memory_space<vmem>>, %arg10: memref<1x16x32xf32, #tpu.memory_space<vmem>>, %arg11: memref<32x8xf32, #tpu.memory_space<vmem>>, %arg12: memref<16x32xf32, #tpu.memory_space<vmem>>) attributes {dimension_semantics = [#tpu.dimension_semantics<parallel>, #tpu.dimension_semantics<arbitrary>], iteration_bounds = array<i64: 2, 2>, scalar_prefetch = 0 : i64, scratch_operands = 2 : i64, tpu.core_type = #tpu.core_type<tc>, window_params = [{transform_indices = @transform_0, window_bounds = array<i64: 1, 16, 32>}, {pipeline_mode = #tpu.pipeline_mode<synchronous>, transform_indices = @transform_1, window_bounds = array<i64: 32, 8>}, {pipeline_mode = #tpu.pipeline_mode<synchronous>, transform_indices = @transform_2, window_bounds = array<i64: 32, 8>}, {pipeline_mode = #tpu.pipeline_mode<synchronous>, transform_indices = @transform_3, window_bounds = array<i64: 32, 32>}, {pipeline_mode = #tpu.pipeline_mode<synchronous>, transform_indices = @transform_4, window_bounds = array<i64: 32, 32>}, {pipeline_mode = #tpu.pipeline_mode<synchronous>, transform_indices = @transform_5, window_bounds = array<i64: 1, 32>}, {pipeline_mode = #tpu.pipeline_mode<synchronous>, transform_indices = @transform_6, window_bounds = array<i64: 32, 32>}, {pipeline_mode = #tpu.pipeline_mode<synchronous>, transform_indices = @transform_7, window_bounds = array<i64: 8, 8>}, {transform_indices = @transform_8, window_bounds = array<i64: 1, 16, 32>}]} {
    %c0_i32 = arith.constant 0 : i32
    %0 = arith.cmpi eq, %arg1, %c0_i32 : i32
    %1 = arith.extui %0 : i1 to i32
    %c0_i32_0 = arith.constant 0 : i32
    %2 = arith.cmpi ne, %1, %c0_i32_0 : i32
    scf.if %2 {
      %cst_58 = arith.constant 0.000000e+00 : f32
      %113 = vector.broadcast %cst_58 : f32 to vector<32x8xf32>
      %c0_59 = arith.constant 0 : index
      %c0_60 = arith.constant 0 : index
      %114 = vector.load %arg11[%c0_59, %c0_60] : memref<32x8xf32, #tpu.memory_space<vmem>>, vector<32x8xf32>
      tpu.vector_store %arg11[%c0_59, %c0_60], %113 {strides = array<i32>} : memref<32x8xf32, #tpu.memory_space<vmem>>, vector<32x8xf32>,
    } else {
    }
    %c0 = arith.constant 0 : index
    %c0_1 = arith.constant 0 : index
    %c0_2 = arith.constant 0 : index
    %3 = vector.load %arg2[%c0, %c0_1, %c0_2] : memref<1x16x32xf32, #tpu.memory_space<vmem>>, vector<1x16x32xf32>
    %4 = vector.shape_cast %3 : vector<1x16x32xf32> to vector<16x32xf32>
    %c0_3 = arith.constant 0 : index
    %c0_4 = arith.constant 0 : index
    %5 = vector.load %arg3[%c0_3, %c0_4] : memref<32x8xf32, #tpu.memory_space<vmem>>, vector<32x8xf32>
    %cst = arith.constant dense<0.000000e+00> : vector<16x8xf32>
    %6 = tpu.matmul %4, %5, %cst {dimension_numbers = #tpu.dot_dimension_numbers<[1], [0], [0], [1], [0, 0, 1, 1], [], []>} : vector<16x32xf32>, vector<32x8xf32>, vector<16x8xf32> -> vector<16x8xf32>
    %c0_5 = arith.constant 0 : index
    %c0_6 = arith.constant 0 : index
    %7 = vector.load %arg4[%c0_5, %c0_6] : memref<32x8xf32, #tpu.memory_space<vmem>>, vector<32x8xf32>
    %cst_7 = arith.constant dense<0.000000e+00> : vector<16x8xf32>
    %8 = tpu.matmul %4, %7, %cst_7 {dimension_numbers = #tpu.dot_dimension_numbers<[1], [0], [0], [1], [0, 0, 1, 1], [], []>} : vector<16x32xf32>, vector<32x8xf32>, vector<16x8xf32> -> vector<16x8xf32>
    %9 = arith.negf %8 : vector<16x8xf32>
    %10 = math.exp %9 : vector<16x8xf32>
    %cst_8 = arith.constant 1.000000e+00 : f32
    %11 = vector.broadcast %cst_8 : f32 to vector<16x8xf32>
    %12 = arith.addf %11, %10 : vector<16x8xf32>
    %13 = arith.divf %11, %12 : vector<16x8xf32>
    %cst_9 = arith.constant dense<0xFF800000> : vector<16xf32>
    %14 = vector.multi_reduction <maximumf>, %6, %cst_9 [1] : vector<16x8xf32> to vector<16xf32>
    %15 = vector.shape_cast %14 : vector<16xf32> to vector<16x1xf32>
    %16 = vector.broadcast %15 : vector<16x1xf32> to vector<16x8xf32>
    %17 = arith.subf %6, %16 : vector<16x8xf32>
    %18 = math.exp %17 : vector<16x8xf32>
    %cst_10 = arith.constant dense<0.000000e+00> : vector<16xf32>
    %19 = vector.multi_reduction <add>, %18, %cst_10 [1] : vector<16x8xf32> to vector<16xf32>
    %20 = vector.shape_cast %19 : vector<16xf32> to vector<16x1xf32>
    %21 = vector.broadcast %20 : vector<16x1xf32> to vector<16x8xf32>
    %22 = arith.divf %18, %21 : vector<16x8xf32>
    %23 = math.exp %13 : vector<16x8xf32>
    %cst_11 = arith.constant 1.000000e+00 : f32
    %24 = vector.broadcast %cst_11 : f32 to vector<16x8xf32>
    %25 = arith.addf %24, %23 : vector<16x8xf32>
    %26 = math.log %25 : vector<16x8xf32>
    %cst_12 = arith.constant 0.000000e+00 : f32
    %27 = vector.broadcast %cst_12 : f32 to vector<16x8xf32>
    %28 = arith.subf %27, %26 : vector<16x8xf32>
    %c0_13 = arith.constant 0 : index
    %c0_14 = arith.constant 0 : index
    %29 = vector.load %arg9[%c0_13, %c0_14] : memref<8x8xf32, #tpu.memory_space<vmem>>, vector<8x8xf32>
    %30 = vector.extract_strided_slice %22 {offsets = [0, 0], sizes = [8, 8], strides = [1, 1]} : vector<16x8xf32> to vector<8x8xf32>
    %31 = vector.extract_strided_slice %13 {offsets = [0, 0], sizes = [8, 8], strides = [1, 1]} : vector<16x8xf32> to vector<8x8xf32>
    %32 = vector.extract_strided_slice %28 {offsets = [0, 0], sizes = [8, 8], strides = [1, 1]} : vector<16x8xf32> to vector<8x8xf32>
    %33 = vector.extract_strided_slice %4 {offsets = [0, 0], sizes = [8, 32], strides = [1, 1]} : vector<16x32xf32> to vector<8x32xf32>
    %cst_15 = arith.constant dense<0.000000e+00> : vector<8x8xf32>
    %34 = tpu.matmul %29, %32, %cst_15 {dimension_numbers = #tpu.dot_dimension_numbers<[1], [0], [0], [1], [0, 0, 1, 1], [], []>} : vector<8x8xf32>, vector<8x8xf32>, vector<8x8xf32> -> vector<8x8xf32>
    %35 = math.exp %34 : vector<8x8xf32>
    %cst_16 = arith.constant 0.000000e+00 : f32
    %36 = vector.broadcast %cst_16 : f32 to vector<8x8xf32>
    %37 = arith.subf %36, %34 : vector<8x8xf32>
    %38 = math.exp %37 : vector<8x8xf32>
    %39 = arith.mulf %30, %35 : vector<8x8xf32>
    %40 = arith.mulf %31, %38 : vector<8x8xf32>
    %41 = vector.extract_strided_slice %35 {offsets = [7, 0], sizes = [1, 8], strides = [1, 1]} : vector<8x8xf32> to vector<1x8xf32>
    %42 = vector.broadcast %41 : vector<1x8xf32> to vector<8x8xf32>
    %43 = arith.mulf %40, %42 : vector<8x8xf32>
    %c0_17 = arith.constant 0 : index
    %c0_18 = arith.constant 0 : index
    %44 = vector.load %arg11[%c0_17, %c0_18] : memref<32x8xf32, #tpu.memory_space<vmem>>, vector<32x8xf32>
    %cst_19 = arith.constant dense<0.000000e+00> : vector<8x8xf32>
    %45 = tpu.matmul %39, %40, %cst_19 {dimension_numbers = #tpu.dot_dimension_numbers<[1], [1], [0], [0], [0, 0, 1, 0], [], []>} : vector<8x8xf32>, vector<8x8xf32>, vector<8x8xf32> -> vector<8x8xf32>
    %46 = arith.mulf %45, %29 : vector<8x8xf32>
    %cst_20 = arith.constant dense<0.000000e+00> : vector<8x32xf32>
    %47 = tpu.matmul %46, %33, %cst_20 {dimension_numbers = #tpu.dot_dimension_numbers<[1], [0], [0], [1], [0, 0, 1, 1], [], []>} : vector<8x8xf32>, vector<8x32xf32>, vector<8x32xf32> -> vector<8x32xf32>
    %cst_21 = arith.constant dense<0.000000e+00> : vector<8x32xf32>
    %48 = tpu.matmul %39, %44, %cst_21 {dimension_numbers = #tpu.dot_dimension_numbers<[1], [1], [0], [0], [0, 0, 1, 0], [], []>} : vector<8x8xf32>, vector<32x8xf32>, vector<8x32xf32> -> vector<8x32xf32>
    %49 = arith.addf %47, %48 : vector<8x32xf32>
    %cst_22 = arith.constant dense<0.000000e+00> : vector<32x8xf32>
    %50 = tpu.matmul %33, %43, %cst_22 {dimension_numbers = #tpu.dot_dimension_numbers<[0], [0], [1], [1], [0, 1, 1, 1], [], []>} : vector<8x32xf32>, vector<8x8xf32>, vector<32x8xf32> -> vector<32x8xf32>
    %51 = vector.broadcast %41 : vector<1x8xf32> to vector<32x8xf32>
    %52 = arith.mulf %44, %51 : vector<32x8xf32>
    %53 = arith.addf %52, %50 : vector<32x8xf32>
    %c0_23 = arith.constant 0 : index
    %c0_24 = arith.constant 0 : index
    %54 = vector.load %arg11[%c0_23, %c0_24] : memref<32x8xf32, #tpu.memory_space<vmem>>, vector<32x8xf32>
    tpu.vector_store %arg11[%c0_23, %c0_24], %53 {strides = array<i32>} : memref<32x8xf32, #tpu.memory_space<vmem>>, vector<32x8xf32>,
    %c0_25 = arith.constant 0 : index
    %c0_26 = arith.constant 0 : index
    %55 = vector.load %arg12[%c0_25, %c0_26] : memref<16x32xf32, #tpu.memory_space<vmem>>, vector<8x32xf32>
    tpu.vector_store %arg12[%c0_25, %c0_26], %49 {strides = array<i32>} : memref<16x32xf32, #tpu.memory_space<vmem>>, vector<8x32xf32>,
    %56 = vector.extract_strided_slice %22 {offsets = [8, 0], sizes = [8, 8], strides = [1, 1]} : vector<16x8xf32> to vector<8x8xf32>
    %57 = vector.extract_strided_slice %13 {offsets = [8, 0], sizes = [8, 8], strides = [1, 1]} : vector<16x8xf32> to vector<8x8xf32>
    %58 = vector.extract_strided_slice %28 {offsets = [8, 0], sizes = [8, 8], strides = [1, 1]} : vector<16x8xf32> to vector<8x8xf32>
    %59 = vector.extract_strided_slice %4 {offsets = [8, 0], sizes = [8, 32], strides = [1, 1]} : vector<16x32xf32> to vector<8x32xf32>
    %cst_27 = arith.constant dense<0.000000e+00> : vector<8x8xf32>
    %60 = tpu.matmul %29, %58, %cst_27 {dimension_numbers = #tpu.dot_dimension_numbers<[1], [0], [0], [1], [0, 0, 1, 1], [], []>} : vector<8x8xf32>, vector<8x8xf32>, vector<8x8xf32> -> vector<8x8xf32>
    %61 = math.exp %60 : vector<8x8xf32>
    %cst_28 = arith.constant 0.000000e+00 : f32
    %62 = vector.broadcast %cst_28 : f32 to vector<8x8xf32>
    %63 = arith.subf %62, %60 : vector<8x8xf32>
    %64 = math.exp %63 : vector<8x8xf32>
    %65 = arith.mulf %56, %61 : vector<8x8xf32>
    %66 = arith.mulf %57, %64 : vector<8x8xf32>
    %67 = vector.extract_strided_slice %61 {offsets = [7, 0], sizes = [1, 8], strides = [1, 1]} : vector<8x8xf32> to vector<1x8xf32>
    %68 = vector.broadcast %67 : vector<1x8xf32> to vector<8x8xf32>
    %69 = arith.mulf %66, %68 : vector<8x8xf32>
    %c0_29 = arith.constant 0 : index
    %c0_30 = arith.constant 0 : index
    %70 = vector.load %arg11[%c0_29, %c0_30] : memref<32x8xf32, #tpu.memory_space<vmem>>, vector<32x8xf32>
    %cst_31 = arith.constant dense<0.000000e+00> : vector<8x8xf32>
    %71 = tpu.matmul %65, %66, %cst_31 {dimension_numbers = #tpu.dot_dimension_numbers<[1], [1], [0], [0], [0, 0, 1, 0], [], []>} : vector<8x8xf32>, vector<8x8xf32>, vector<8x8xf32> -> vector<8x8xf32>
    %72 = arith.mulf %71, %29 : vector<8x8xf32>
    %cst_32 = arith.constant dense<0.000000e+00> : vector<8x32xf32>
    %73 = tpu.matmul %72, %59, %cst_32 {dimension_numbers = #tpu.dot_dimension_numbers<[1], [0], [0], [1], [0, 0, 1, 1], [], []>} : vector<8x8xf32>, vector<8x32xf32>, vector<8x32xf32> -> vector<8x32xf32>
    %cst_33 = arith.constant dense<0.000000e+00> : vector<8x32xf32>
    %74 = tpu.matmul %65, %70, %cst_33 {dimension_numbers = #tpu.dot_dimension_numbers<[1], [1], [0], [0], [0, 0, 1, 0], [], []>} : vector<8x8xf32>, vector<32x8xf32>, vector<8x32xf32> -> vector<8x32xf32>
    %75 = arith.addf %73, %74 : vector<8x32xf32>
    %cst_34 = arith.constant dense<0.000000e+00> : vector<32x8xf32>
    %76 = tpu.matmul %59, %69, %cst_34 {dimension_numbers = #tpu.dot_dimension_numbers<[0], [0], [1], [1], [0, 1, 1, 1], [], []>} : vector<8x32xf32>, vector<8x8xf32>, vector<32x8xf32> -> vector<32x8xf32>
    %77 = vector.broadcast %67 : vector<1x8xf32> to vector<32x8xf32>
    %78 = arith.mulf %70, %77 : vector<32x8xf32>
    %79 = arith.addf %78, %76 : vector<32x8xf32>
    %c0_35 = arith.constant 0 : index
    %c0_36 = arith.constant 0 : index
    %80 = vector.load %arg11[%c0_35, %c0_36] : memref<32x8xf32, #tpu.memory_space<vmem>>, vector<32x8xf32>
    tpu.vector_store %arg11[%c0_35, %c0_36], %79 {strides = array<i32>} : memref<32x8xf32, #tpu.memory_space<vmem>>, vector<32x8xf32>,
    %c8 = arith.constant 8 : index
    %c0_37 = arith.constant 0 : index
    %81 = vector.load %arg12[%c8, %c0_37] : memref<16x32xf32, #tpu.memory_space<vmem>>, vector<8x32xf32>
    tpu.vector_store %arg12[%c8, %c0_37], %75 {strides = array<i32>} : memref<16x32xf32, #tpu.memory_space<vmem>>, vector<8x32xf32>,
    %c0_38 = arith.constant 0 : index
    %c0_39 = arith.constant 0 : index
    %82 = vector.load %arg12[%c0_38, %c0_39] : memref<16x32xf32, #tpu.memory_space<vmem>>, vector<16x32xf32>
    %c0_40 = arith.constant 0 : index
    %c0_41 = arith.constant 0 : index
    %83 = vector.load %arg5[%c0_40, %c0_41] : memref<32x32xf32, #tpu.memory_space<vmem>>, vector<32x32xf32>
    %cst_42 = arith.constant dense<0.000000e+00> : vector<16x32xf32>
    %84 = tpu.matmul %82, %83, %cst_42 {dimension_numbers = #tpu.dot_dimension_numbers<[1], [0], [0], [1], [0, 0, 1, 1], [], []>} : vector<16x32xf32>, vector<32x32xf32>, vector<16x32xf32> -> vector<16x32xf32>
    %c0_43 = arith.constant 0 : index
    %c0_44 = arith.constant 0 : index
    %85 = vector.load %arg6[%c0_43, %c0_44] : memref<32x32xf32, #tpu.memory_space<vmem>>, vector<32x32xf32>
    %cst_45 = arith.constant dense<0.000000e+00> : vector<16x32xf32>
    %86 = tpu.matmul %4, %85, %cst_45 {dimension_numbers = #tpu.dot_dimension_numbers<[1], [0], [0], [1], [0, 0, 1, 1], [], []>} : vector<16x32xf32>, vector<32x32xf32>, vector<16x32xf32> -> vector<16x32xf32>
    %87 = arith.addf %84, %86 : vector<16x32xf32>
    %88 = arith.mulf %82, %82 : vector<16x32xf32>
    %cst_46 = arith.constant dense<0.000000e+00> : vector<16xf32>
    %89 = vector.multi_reduction <add>, %88, %cst_46 [1] : vector<16x32xf32> to vector<16xf32>
    %90 = vector.shape_cast %89 : vector<16xf32> to vector<16x1xf32>
    %cst_47 = arith.constant 3.200000e+01 : f32
    %91 = vector.broadcast %cst_47 : f32 to vector<16x1xf32>
    %92 = arith.divf %90, %91 : vector<16x1xf32>
    %cst_48 = arith.constant 9.99999974E-6 : f32
    %93 = vector.broadcast %cst_48 : f32 to vector<16x1xf32>
    %94 = arith.addf %92, %93 : vector<16x1xf32>
    %95 = math.rsqrt %94 : vector<16x1xf32>
    %96 = vector.broadcast %95 : vector<16x1xf32> to vector<16x32xf32>
    %97 = arith.mulf %82, %96 : vector<16x32xf32>
    %c0_49 = arith.constant 0 : index
    %c0_50 = arith.constant 0 : index
    %98 = vector.load %arg7[%c0_49, %c0_50] : memref<1x32xf32, #tpu.memory_space<vmem>>, vector<1x32xf32>
    %99 = vector.broadcast %98 : vector<1x32xf32> to vector<16x32xf32>
    %100 = arith.mulf %97, %99 : vector<16x32xf32>
    %101 = arith.negf %87 : vector<16x32xf32>
    %102 = math.exp %101 : vector<16x32xf32>
    %cst_51 = arith.constant 1.000000e+00 : f32
    %103 = vector.broadcast %cst_51 : f32 to vector<16x32xf32>
    %104 = arith.addf %103, %102 : vector<16x32xf32>
    %105 = arith.divf %103, %104 : vector<16x32xf32>
    %106 = arith.mulf %87, %105 : vector<16x32xf32>
    %107 = arith.mulf %100, %106 : vector<16x32xf32>
    %c0_52 = arith.constant 0 : index
    %c0_53 = arith.constant 0 : index
    %108 = vector.load %arg8[%c0_52, %c0_53] : memref<32x32xf32, #tpu.memory_space<vmem>>, vector<32x32xf32>
    %cst_54 = arith.constant dense<0.000000e+00> : vector<16x32xf32>
    %109 = tpu.matmul %107, %108, %cst_54 {dimension_numbers = #tpu.dot_dimension_numbers<[1], [0], [0], [1], [0, 0, 1, 1], [], []>} : vector<16x32xf32>, vector<32x32xf32>, vector<16x32xf32> -> vector<16x32xf32>
    %c0_55 = arith.constant 0 : index
    %c0_56 = arith.constant 0 : index
    %c0_57 = arith.constant 0 : index
    %110 = vector.load %arg10[%c0_55, %c0_56, %c0_57] : memref<1x16x32xf32, #tpu.memory_space<vmem>>, vector<1x16x32xf32>
    %111 = vector.shape_cast %110 : vector<1x16x32xf32> to vector<16x32xf32>
    %112 = vector.shape_cast %109 : vector<16x32xf32> to vector<1x16x32xf32>
    tpu.vector_store %arg10[%c0_55, %c0_56, %c0_57], %112 {strides = array<i32>} : memref<1x16x32xf32, #tpu.memory_space<vmem>>, vector<1x16x32xf32>,
    return
  }
  func.func @transform_0(%arg0: i32, %arg1: i32) -> (i32, i32, i32) {
    %c0_i32 = arith.constant 0 : i32
    %c0_i32_0 = arith.constant 0 : i32
    return %arg0, %arg1, %c0_i32 : i32, i32, i32
  }
  func.func @transform_1(%arg0: i32, %arg1: i32) -> (i32, i32) {
    %c0_i32 = arith.constant 0 : i32
    %c0_i32_0 = arith.constant 0 : i32
    %c0_i32_1 = arith.constant 0 : i32
    return %c0_i32, %c0_i32_0 : i32, i32
  }
  func.func @transform_2(%arg0: i32, %arg1: i32) -> (i32, i32) {
    %c0_i32 = arith.constant 0 : i32
    %c0_i32_0 = arith.constant 0 : i32
    %c0_i32_1 = arith.constant 0 : i32
    return %c0_i32, %c0_i32_0 : i32, i32
  }
  func.func @transform_3(%arg0: i32, %arg1: i32) -> (i32, i32) {
    %c0_i32 = arith.constant 0 : i32
    %c0_i32_0 = arith.constant 0 : i32
    %c0_i32_1 = arith.constant 0 : i32
    return %c0_i32, %c0_i32_0 : i32, i32
  }
  func.func @transform_4(%arg0: i32, %arg1: i32) -> (i32, i32) {
    %c0_i32 = arith.constant 0 : i32
    %c0_i32_0 = arith.constant 0 : i32
    %c0_i32_1 = arith.constant 0 : i32
    return %c0_i32, %c0_i32_0 : i32, i32
  }
  func.func @transform_5(%arg0: i32, %arg1: i32) -> (i32, i32) {
    %c0_i32 = arith.constant 0 : i32
    %c0_i32_0 = arith.constant 0 : i32
    %c0_i32_1 = arith.constant 0 : i32
    return %c0_i32, %c0_i32_0 : i32, i32
  }
  func.func @transform_6(%arg0: i32, %arg1: i32) -> (i32, i32) {
    %c0_i32 = arith.constant 0 : i32
    %c0_i32_0 = arith.constant 0 : i32
    %c0_i32_1 = arith.constant 0 : i32
    return %c0_i32, %c0_i32_0 : i32, i32
  }
  func.func @transform_7(%arg0: i32, %arg1: i32) -> (i32, i32) {
    %c0_i32 = arith.constant 0 : i32
    %c0_i32_0 = arith.constant 0 : i32
    %c0_i32_1 = arith.constant 0 : i32
    return %c0_i32, %c0_i32_0 : i32, i32
  }
  func.func @transform_8(%arg0: i32, %arg1: i32) -> (i32, i32, i32) {
    %c0_i32 = arith.constant 0 : i32
    %c0_i32_0 = arith.constant 0 : i32
    return %arg0, %arg1, %c0_i32 : i32, i32, i32
  }
}

</mosaic_0001>

<bundles_post_ra>
// kernel: tpu_custom_call.1
= control target key start
LH: loop header
LB: loop body
LE: loop exit
PB: predicated region body
PF: predicated region fallthrough
CT: control target
= control target key end

     0   :  { %13 = vsyncpa [#allocation5], 0  ;;  %s3028_s0 = inlined_call_operand.vmem [shape: f32[2,32,32], index: 0, kind: input, shape index: {}]   ;;  %s3029_s1 = inlined_call_operand.vmem [shape: f32[32,8], index: 1, kind: input, shape index: {}]   ;;  %s3030_s2 = inlined_call_operand.vmem [shape: f32[32,8], index: 2, kind: input, shape index: {}]   ;;  %s3031_s3 = inlined_call_operand.hbm [shape: f32[32,32], index: 3, kind: input, shape index: {}]   ;;  %s3032_s4 = inlined_call_operand.hbm [shape: f32[32,32], index: 4, kind: input, shape index: {}]   ;;  %s3033_s5 = inlined_call_operand.vmem [shape: f32[1,32], index: 5, kind: input, shape index: {}]   ;;  %s3034_s6 = inlined_call_operand.vmem [shape: f32[32,32], index: 6, kind: input, shape index: {}]   ;;  %s3035_s7 = inlined_call_operand.vmem [shape: f32[8,8], index: 7, kind: input, shape index: {}]   ;;  %s3036_s8 = inlined_call_operand.hbm [shape: f32[2,32,32], index: 8, kind: output, shape index: {}]  }
   0x1   :  { %14 = vsyncpa [#allocation8], 0 }
   0x2   :  { %15 = vsyncpa [#allocation6], 0 }
   0x3   :  { %17 = vsyncpa [#allocation6 + $0x1], 0  ;;  %s2595_s27 = smov 0   ;;  %s2597_s28 = smov 0  }
   0x4   :  { %s2599_s29 = smov 0   ;;  %s2601_s30 = smov 0  }
   0x5   :  { %s2603_s9 = smov 0   ;;  %s2605_s10 = smov 0  }
   0x6   :  { %s2607_s11 = smov 0   ;;  %s2609_s12 = smov 0  }
   0x7 LB: > { %3048 = sst [smem:[#allocation13_spill]] %s2509_s27  ;;  %s1927_s13 = sadd.s32 4294967295, %s2537_s12   ;;  %s2537_s12 = sphi %s2609_s12, %s23_s12   ;;  %s2533_s11 = sphi %s2607_s11, %s3074_s11   ;;  %s2529_s10 = sphi %s2605_s10, %s3073_s10   ;;  %s2525_s9 = sphi %s2603_s9, %s3072_s9   ;;  %s2521_s30 = sphi %s2601_s30, %s3071_s30   ;;  %s2517_s29 = sphi %s2599_s29, %s3070_s29   ;;  %s2513_s28 = sphi %s2597_s28, %s3076_s28   ;;  %s2509_s27 = sphi %s2595_s27, %s3075_s27  }
   0x8   : > { %3049 = sst [smem:[#allocation14_spill]] %s2517_s29  ;;  %s1928_s14 = sadd.s32 4294967294, %s2537_s12  }
   0x9   : > { %3050 = sst [smem:[#allocation15_spill]] %s2529_s10  ;;  %s32_s15 = sadd.s32 1, %s2529_s10 }
   0xa   : > { %3051 = sst [smem:[#allocation16_spill]] %s2533_s11  ;;  %s35_s16 = sadd.s32 1, %s2533_s11 }
   0xb   : > { %p33_p0 = scmp.ge.s32.totalorder %s32_s15, 2  ;;  %s219_s17 = sadd.s32 1, %s2517_s29 }
   0xc   : > { %p229_p1 = scmp.ne.s32.totalorder %s2517_s29, %s2513_s28  ;;  %p230_p2 = scmp.eq.s32.totalorder %s1927_s13, 3 }
   0xd   : > { %s3078_s15 = smov (%p33_p0, %s32_s15), 0  ;;  %s3080_s16 = smov (!%p33_p0, %s35_s16), %s2533_s11 }
   0xe   : > { %3052 = sst [smem:[#allocation17_spill]] %s3078_s15  ;;  %s215_s18 = ssub.s32 %s2529_s10, %s3078_s15 }
   0xf   : > { %p2647_p3 = por %p230_p2, %p229_p1  ;;  %p37_p4 = scmp.ge.s32.totalorder %s3080_s16, 2 }
  0x10   : > { %p235_p5 = scmp.ne.s32.totalorder %s2513_s28, %s2509_s27  ;;  %p236_p6 = scmp.eq.s32.totalorder %s1928_s14, 3 }
  0x11   : > { %s3053_s19 = scalar_select %p2647_p3, 1, 0 }
  0x12   : > { %p1929_p7 = scmp.ge.s32.totalorder %s2537_s12, 1  ;;  %s3082_s16 = smov (%p37_p4, %s3080_s16), 0 }
  0x13   : > { %3054 = sst [smem:[#allocation18_spill]] %s3082_s16  ;;  %p2656_p8 = por %p236_p6, %p235_p5 }
  0x14   : > { %p243_p9 = scmp.lt.s32.totalorder %s2537_s12, 5  ;;  %s214_s21 = ssub.s32 %s2533_s11, %s3082_s16 }
  0x15   : > { %s3055_s20 = scalar_select %p2656_p8, 1, 0 }
  0x16   : > { %s216_s22 = sor.u32 %s215_s18, %s214_s21  ;;  %p2663_p10 = pnand %p1929_p7, %p243_p9 }
  0x17   : > { %3056 = sst [smem:[#allocation19_spill]] %s3055_s20  ;;  %p217_p11 = scmp.eq.s32.totalorder %s216_s22, 0 }
  0x18   : > { %s3057_s23 = scalar_select %p2663_p10, 1, 0 }
  0x19   : > { %p2667_p12 = scmp.eq.s32.totalorder %s1927_s13, 0  ;;  %p2245_p13 = pneg %p2663_p10 }
  0x1a   : > { %s2674_s25 = scalar_select %p217_p11, %s2517_s29, %s219_s17  }
  0x1b   : > { %s3058_s24 = scalar_select %p2667_p12, 1, 0 }
  0x1c   : > { %3059 = sst [smem:[#allocation20_spill]] %s2674_s25  ;;  %s2539_s26 = smov [#allocation4]  }
  0x1d   : > { %s261_s14 = sshll.u32 %s2539_s26, 4  ;;  %p2678_p0 = pnand %p2667_p12, %p2245_p13  ;;  %s262_s14 = int_to_ptr.vmem [resolvable:$true] %s261_s14 }
  0x1e   : > { %s2379_s22 = scalar_lea.hbm %s3031_s3, 512 }
  0x1f   : > { %p2380_p1 = scmp.ne.s32.totalorder %s3031_s3, %s2379_s22  ;;  %p2381_p2 = pneg %p2678_p0 }
  0x20   : > { %p2386_p6 = scmp.lt.u32.totalorder %s2379_s22, %s3031_s3 }
  0x21   : > { %p2382_p4 = pnand %p2381_p2, %p2380_p1 }
  0x23   : > { %p2383_p5 = pneg %p2382_p4 }
  0x25   : > { %p2388_p7 = pnand %p2386_p6, %p2383_p5 }
  0x27   : > { %2391 = shalt.err (!%p2388_p7)
}
  0x28   : > { %s2392_s11 = scalar_lea.vmem %s262_s14, 512  ;;  %p2400_p8 = scmp.lt.s32.totalorder %s262_s14, %s262_s14 }
  0x29   : > { %p2393_p9 = scmp.ne.s32.totalorder %s262_s14, %s2392_s11  ;;  %p2401_p3 = scmp.lt.s32.totalorder %s2392_s11, %s2392_s11 }
  0x2b   : > { %p2395_p11 = pnand %p2393_p9, %p2381_p2  ;;  %p2402_p12 = por %p2401_p3, %p2400_p8 }
  0x2d   : > { %p2396_p13 = pneg %p2395_p11 }
  0x2f   : > { %p2403_p10 = pnand %p2402_p12, %p2396_p13 }
  0x31   : > { %2406 = shalt.err (!%p2403_p10)
}
  0x32   : > { %s2540_s15 = smov 128   ;;  %s2541_s16 = smov 8  }
  0x33   : > { %2248 = dma.hbm_to_vmem [thread:$0]  (!%p2678_p0), %s3031_s3, 512, %s262_s14, [#allocation5], %s2540_s15, %s2540_s15, %s2541_s16  }
  0x34   : > { %s2542_s22 = smov [#allocation7]   ;;  %s2407_s25 = scalar_lea.hbm %s3032_s4, 512 }
  0x35   : > { %s274_s17 = sshll.u32 %s2542_s22, 4  ;;  %p2408_p3 = scmp.ne.s32.totalorder %s3032_s4, %s2407_s25  ;;  %s275_s17 = int_to_ptr.vmem [resolvable:$true] %s274_s17 }
  0x36   : > { %p2414_p12 = scmp.lt.u32.totalorder %s2407_s25, %s3032_s4 }
  0x37   : > { %p2410_p8 = pnand %p2408_p3, %p2381_p2 }
  0x39   : > { %p2411_p10 = pneg %p2410_p8 }
  0x3b   : > { %p2416_p1 = pnand %p2414_p12, %p2411_p10 }
  0x3d   : > { %2419 = shalt.err (!%p2416_p1)
}
  0x3e   : > { %s2420_s14 = scalar_lea.vmem %s275_s17, 512  ;;  %p2428_p7 = scmp.lt.s32.totalorder %s275_s17, %s275_s17 }
  0x3f   : > { %p2421_p4 = scmp.ne.s32.totalorder %s275_s17, %s2420_s14  ;;  %p2429_p9 = scmp.lt.s32.totalorder %s2420_s14, %s2420_s14 }
  0x41   : > { %p2423_p5 = pnand %p2421_p4, %p2381_p2  ;;  %p2430_p11 = por %p2429_p9, %p2428_p7 }
  0x43   : > { %p2424_p6 = pneg %p2423_p5 }
  0x45   : > { %p2431_p13 = pnand %p2430_p11, %p2424_p6 }
  0x47   : > { %2434 = shalt.err (!%p2431_p13)
}
  0x48   : > { %2251 = dma.hbm_to_vmem [thread:$0]  (!%p2678_p0), %s3032_s4, 512, %s275_s17, [#allocation8], %s2540_s15, %s2540_s15, %s2541_s16  }
  0x49   : > { %p3061_p3 = scmp.ne.s32.totalorder %s3057_s23, 0 }
  0x4a   : > { %p3062_p8 = scmp.ne.s32.totalorder (!%p3061_p3), %s3058_s24, 0 }
  0x4b   : > { %312 = sbr.rel (%p3061_p3) target bundleno = 1789 (0x6fd), region = 52 }
  0x52   : > { %2496 = dma.done.wait (%p3062_p8), [#allocation5], 512  }
  0x53   : > { %2498 = vsyncadd (%p3062_p8), [#allocation5], 4294966784 }
  0x54   : > { %2500 = dma.done.wait (%p3062_p8), [#allocation8], 512  }
  0x55   : > { %2502 = vsyncadd (%p3062_p8), [#allocation8], 4294966784  ;;  %s351_s27 = sand.u32 1, %s2513_s28   ;;  %s2736_s20 = sshll.u32 %s2521_s30, 1 }
  0x56   : > { %s1936_s23 = sshll.u32 %s351_s27, 4  ;;  %p355_p0 = scmp.lt.s32.totalorder %s2525_s9, 1 }
  0x57   : > { %p357_p2 = scmp.lt.s32.totalorder %s2736_s20, 3  ;;  %s2749_s17 = scalar_lea.vmem [#allocation9], %s1936_s23 }
  0x58   : > { %s356_s25 = scalar_select %p355_p0, %s2525_s9, 1 }
  0x59   : > { %s358_s18 = scalar_select %p357_p2, %s2736_s20, 3 }
  0x5a   : > { %s1938_s15 = sshll.u32 %s356_s25, 2  ;;  %p1940_p10 = scmp.ne.s32.totalorder %s2521_s30, 0 }
  0x5b   : > { %s360_s16 = sadd.s32 %s1938_s15, %s358_s18  ;;  %vm369_vm0 = vcmask (!%p1940_p10), 64512   ;;  %v2543_v0 = vmov (!%p1940_p10), 0.0  }
  0x5c   : > { %s1939_s24 = sshll.u32 %s360_s16, 3  ;;  %368 = sbr.rel (%p1940_p10) target bundleno = 99 (0x63), region = 64  ;;  %370 = vst.msk [vmem:[#allocation2] sm:$0xff] (!%p1940_p10), %vm369_vm0, %v2543_v0  ;;  %371 = vst.msk [vmem:[#allocation2 + $0x8] sm:$0xff] (!%p1940_p10), %vm369_vm0, %v2543_v0 }
  0x5d   : > { %s2747_s22 = scalar_lea.vmem %s3028_s0, %s1939_s24  ;;  %372 = vst.msk [vmem:[#allocation2 + $0x10] sm:$0xff] (!%p1940_p10), %vm369_vm0, %v2543_v0  ;;  %373 = vst.msk [vmem:[#allocation2 + $0x18] sm:$0xff] (!%p1940_p10), %vm369_vm0, %v2543_v0 }
  0x63 PF: > { %v376_v1 = vld [vmem:[%s3029_s1] sm:$0xff]  ;;  %v377_v2 = vld [vmem:[%s3029_s1 + $0x8] sm:$0xff]  ;;  %vm380_vm1 = vcmask 261120   ;;  %v378_v6 = vld [vmem:[%s3029_s1 + $0x10] sm:$0xff]  ;;  %v2544_v15 = vmov 0.0   ;;  %vm2545_vm2 = vmmov 0   ;;  %v669_v62 = vlaneseq }
  0x64   : > { %v462_v3 = vld [vmem:[%s3030_s2] sm:$0xff]  ;;  %v2173_v4 = vpack.c.bf16 %v377_v2, %v376_v1  ;;  %v463_v5 = vld [vmem:[%s3030_s2 + $0x8] sm:$0xff]  ;;  %v379_v7 = vld [vmem:[%s3029_s1 + $0x18] sm:$0xff]  ;;  %vm553_vm3 = vcmask 64512   ;;  %v2546_v47 = vmov 0.0|0.0   ;;  %s1984_s13 = sshll.u32 %s2525_s9, 2 }
  0x65   : > { %v2181_v8 = vpack.c.bf16 %v463_v5, %v462_v3  ;;  %v2177_v9 = vpack.c.bf16 %v379_v7, %v378_v6  ;;  %v464_v10 = vld [vmem:[%s3030_s2 + $0x10] sm:$0xff]  ;;  %v465_v11 = vld [vmem:[%s3030_s2 + $0x18] sm:$0xff]  ;;  %v2777_v12 = vld [vmem:[%s2747_s22] sm:$0xff]  ;;  %v2850_v0 = vshrl.u32 %v669_v62, 7  ;;  %s1820_s26 = sadd.s32 %s1984_s13, %s2736_s20  ;;  %s2976_s9 = scalar_lea.sflag [#allocation6], %s351_s27 }
  0x66   : > { %2174 = vmatprep.subr.bf16.mxu0 %v2173_v4  ;;  %v2185_v13 = vpack.c.bf16 %v465_v11, %v464_v10  ;;  %2058 = vmatprep.mubr.msk.f32.mxu0 %vm380_vm1, %v2777_v12  ;;  %v2785_v14 = vld [vmem:[%s2747_s22 + $0x8] sm:$0xff]  ;;  %v2805_v32 = vld [vmem:[%s3035_s7] sm:$0xff]  ;;  %vm2833_vm4 = vmpackc.low %vm553_vm3, %vm553_vm3  ;;  %s1985_s11 = sshll.u32 %s1820_s26, 7  ;;  %s1823_s22 = sshll.u32 %s2749_s17, 4  ;;  %s2968_s22 = int_to_ptr.vmem [resolvable:$true] %s1823_s22 }
  0x67   : > { %2182 = vmatprep.subr.bf16.mxu1 %v2181_v8  ;;  %2176 = vmatpush3.bf16.msra.mxu0 %v2173_v4  ;;  %v2825_v48 = vld [vmem:[#allocation2] sm:$0xff]  ;;  %v2827_v49 = vld [vmem:[#allocation2 + $0x8] sm:$0xff]  ;;  %v2840_v52 = vld [vmem:[#allocation2 + $0x10] sm:$0xff]  ;;  %v671_v2 = vsub.s32 7, %v2850_v0  ;;  %s2966_s10 = scalar_lea.hbm %s3036_s8, %s1985_s11  ;;  %s2435_s20 = scalar_lea.vmem %s2968_s22, 256 }
  0x68   : > { %2184 = vmatpush3.bf16.msra.mxu1 %v2181_v8  ;;  %2178 = vmatprep.subr.bf16.mxu0 %v2177_v9  ;;  %v2190_v50 = vpack.c.bf16 %v2827_v49, %v2825_v48  ;;  %v2842_v53 = vld [vmem:[#allocation2 + $0x18] sm:$0xff]  ;;  %p2436_p12 = scmp.ne.s32.totalorder %s2968_s22, %s2435_s20  ;;  %p3065_p1 = scmp.ne.s32.totalorder %s3053_s19, 0 }
  0x69   : > { %2186 = vmatprep.subr.bf16.mxu1 %v2185_v13  ;;  %2069 = vmatprep.mubr.msk.f32.mxu1 %vm380_vm1, %v2777_v12  ;;  %v2194_v54 = vpack.c.bf16 %v2842_v53, %v2840_v52  ;;  %s2547_s23 = smov [#allocation9]  }
  0x6a   : > { %910 = vxpose.xlu1.b32.start.end [1/1] (short) (narrow) %v2777_v12, 32  ;;  %p2437_p4 = pnand %p2436_p12, %p3065_p1  ;;  %s2439_s30 = sshll.u32 %s2547_s23, 4  ;;  %s2440_s30 = int_to_ptr.vmem [resolvable:$false] %s2439_s30 }
  0x6b   : > { %2180 = vmatpush3.bf16.msra.mxu0 %v2177_v9  ;;  %s2441_s25 = scalar_lea.vmem %s2440_s30, 512  ;;  %p2442_p6 = scmp.lt.s32.totalorder %s2968_s22, %s2440_s30 }
  0x6c   : > { %2188 = vmatpush3.bf16.msra.mxu1 %v2185_v13  ;;  %2072 = vmatprep.subr.mxu0 %v2544_v15  ;;  %p2438_p5 = pneg %p2437_p4  ;;  %p2443_p7 = scmp.lt.s32.totalorder %s2441_s25, %s2435_s20 }
  0x6d   : > { %2077 = vmatprep.subr.mxu1 %v2544_v15 }
  0x6e   : > { %2059 = vmatmul.mubr.msk.f32.vlgmr.msra.gmra.mrb[0].mxu0 %vm380_vm1, %v2785_v14  ;;  %p2444_p9 = por %p2443_p7, %p2442_p6 }
  0x6f   : > { %2070 = vmatmul.mubr.msk.f32.vlgmr.msra.gmra.mrb[0].mxu1 %vm380_vm1, %v2785_v14  ;;  %2074 = vmatprep.mubr.msk.f32.mxu0 %vm2545_vm2, %v2544_v15 }
  0x70   : > { %2079 = vmatprep.mubr.msk.f32.mxu1 %vm2545_vm2, %v2544_v15  ;;  %p2445_p11 = pnand %p2444_p9, %p2438_p5 }
  0xea   : > { %v2811_v33 = vpop.trf.xlu1 }
  0xee   : > { %v2813_v34 = vpop.trf.xlu1 }
  0xf2   : > { %v2815_v35 = vpop.trf.xlu1 }
  0xf6   : > { %v2817_v36 = vpop.trf.xlu1 }
 0x141   : > { %v2060_v16 = vpop.f32.mrb[0].mxu0 }
 0x142   : > { %v2071_v17 = vpop.f32.mrb[0].mxu1  ;;  %v453_v18 = vpop.f32.mrb[1].mxu0  ;;  %v557_v19 = vsel %vm553_vm3, %v2060_v16, -inf }
 0x143   : > { %v532_v20 = vpop.f32.mrb[1].mxu1  ;;  %558 = vmax.xlane.f32.xlu1 %v557_v19  ;;  %v554_v21 = vsel %vm553_vm3, %v453_v18, -inf  ;;  %v1946_v55 = vmul.f32 -1.442695, %v2071_v17 }
 0x144   : > { %v1945_v22 = vmul.f32 -1.442695, %v532_v20  ;;  %555 = vmax.xlane.f32.xlu0 %v554_v21 }
 0x146   : > { %2335 = vpow2.f32 %v1945_v22 }
 0x150   : > { %v2336_v23 = vpop.eup %2335 }
 0x151   : > { %v547_v24 = vadd.f32 1.0, %v2336_v23 }
 0x153   : > { %2337 = vrcp.f32 %v547_v24 }
 0x15d   : > { %v2799_v25 = vpop.eup %2337 }
 0x15e   : > { %v576_v26 = vmul.f32 1.442695, %v2799_v25 }
 0x160   : > { %2339 = vpow2.f32 %v576_v26 }
 0x16a   : > { %v2340_v27 = vpop.eup %2339 }
 0x16b   : > { %v580_v28 = vadd.f32 1.0, %v2340_v27 }
 0x16d   : > { %2341 = vlog2.f32 %v580_v28 }
 0x177   : > { %v2342_v29 = vpop.eup %2341 }
 0x178   : > { %v583_v30 = vmul.f32 0.6931472, %v2342_v29 }
 0x17a   : > { %v586_v31 = vsub.f32 0.0, %v583_v30 }
 0x17c   : > { %2073 = vmatpush3.msra.mxu0 %v586_v31 }
 0x17d   : > { %2075 = vmatmul.mubr.msk.f32.vlgmr.msra.gmra.mrb[2].mxu0 %vm553_vm3, %v2805_v32  ;;  %2189 = vmatprep.subr.bf16.mxu0 %v2546_v47 }
 0x17e   : > { %2090 = vmatprep.mubr.msk.f32.mxu0 %vm2545_vm2, %v2544_v15 }
 0x183   : > { %2192 = vmatpush3.bf16.xpose.msk.msra.mxu0 %vm2833_vm4, %v2190_v50 }
 0x184   : > { %2193 = vmatprep.subr.bf16.mxu0 %v2546_v47 }
 0x18b   : > { %2196 = vmatpush3.bf16.xpose.msk.msra.mxu0 %vm2833_vm4, %v2194_v54 }
 0x18c   : > { %2093 = vmatprep.subr.mxu0 %v2544_v15 }
 0x1d0   : > { %v559_v37 = vpop.xlane.xlu1 %558 }
 0x1d1   : > { %v561_v38 = vsub.f32 %v2060_v16, %v559_v37  ;;  %v556_v39 = vpop.xlane.xlu0 %555 }
 0x1d2   : > { %v560_v40 = vsub.f32 %v453_v18, %v556_v39 }
 0x1d3   : > { %v564_v41 = vmul.f32 1.442695, %v561_v38 }
 0x1d4   : > { %v562_v42 = vmul.f32 1.442695, %v560_v40 }
 0x1d6   : > { %2343 = vpow2.f32 %v562_v42 }
 0x1d7   : > { %2345 = vpow2.f32 %v564_v41 }
 0x1d8   : > { %2347 = vpow2.f32 %v1946_v55 }
 0x1e0   : > { %v2344_v43 = vpop.eup %2343 }
 0x1e1   : > { %v566_v44 = vsel %vm553_vm3, %v2344_v43, 0.0  ;;  %v2820_v45 = vpop.eup %2345 }
 0x1e2   : > { %567 = vadd.xlane.f32.xlu0 %v566_v44  ;;  %v569_v46 = vsel %vm553_vm3, %v2820_v45, 0.0  ;;  %v2348_v56 = vpop.eup %2347 }
 0x1e3   : > { %v548_v57 = vadd.f32 1.0, %v2348_v56 }
 0x1e5   : > { %2349 = vrcp.f32 %v548_v57 }
 0x1e6   : > { %570 = vadd.xlane.f32.xlu0 %v569_v46 }
 0x1ef   : > { %v2852_v1 = vpop.eup %2349 }
 0x1f0   : > { %v578_v3 = vmul.f32 1.442695, %v2852_v1 }
 0x213   : > { %1370 = vxpose.xlu0.b32.start.end [1/1] (short) (narrow) %v2785_v14, 32 }
 0x250   : > { %v658_v58 = vpop.f32.mrb[2].mxu0 }
 0x251   : > { %v662_v59 = vmul.f32 1.442695, %v658_v58  ;;  %v664_v60 = vsub.f32 0.0, %v658_v58  ;;  %v2076_v61 = vpop.f32.mrb[3].mxu0 }
 0x253   : > { %2351 = vpow2.f32 %v662_v59  ;;  %v665_v63 = vmul.f32 1.442695, %v664_v60 }
 0x255   : > { %2353 = vpow2.f32 %v665_v63  ;;  %v1519_v63 = vld [vmem:[#allocation7 + $0x8] sm:$0xff] }
 0x256   : > { %2355 = vpow2.f32 %v578_v3 }
 0x25d   : > { %v2352_v4 = vpop.eup %2351 }
 0x25e   : > { %v672_v5 = vrot.slane %v2352_v4, %v671_v2 }
 0x25f   : > { %v2354_v6 = vpop.eup %2353 }
 0x260   : > { %v668_v7 = vmul.f32 %v2354_v6, %v2799_v25  ;;  %v2356_v9 = vpop.eup %2355  ;;  %v1040_v25 = vmul.f32 %v2827_v49, %v672_v5  ;;  %v1039_v28 = vmul.f32 %v2825_v48, %v672_v5 }
 0x261   : > { %v581_v10 = vadd.f32 1.0, %v2356_v9 }
 0x262   : > { %2078 = vmatpush3.xpose.msk.msra.mxu1 %vm553_vm3, %v668_v7  ;;  %v673_v8 = vmul.f32 %v672_v5, %v668_v7 }
 0x264   : > { %2098 = vmatprep.subr.mxu1 %v673_v8 }
 0x26f   : > { %v568_v11 = vpop.xlane.xlu0 %567 }
 0x270   : > { %2357 = vrcp.f32 %v568_v11 }
 0x271   : > { %2359 = vlog2.f32 %v581_v10 }
 0x273   : > { %v571_v21 = vpop.xlane.xlu0 %570 }
 0x27a   : > { %v2358_v13 = vpop.eup %2357 }
 0x27b   : > { %v2360_v16 = vpop.eup %2359  ;;  %v573_v17 = vmul.f32 %v2358_v13, %v2344_v43 }
 0x27c   : > { %v585_v19 = vmul.f32 0.6931472, %v2360_v16 }
 0x27d   : > { %v667_v18 = vmul.f32 %v2352_v4, %v573_v17 }
 0x27e   : > { %v587_v20 = vsub.f32 0.0, %v585_v19 }
 0x27f   : > { %2080 = vmatmul.mubr.msk.f32.vlgmr.msra.gmra.mrb[2].mxu1 %vm553_vm3, %v667_v18  ;;  %2091 = vmatmul.mubr.msk.f32.vlgmr.msra.gmra.mrb[4].mxu0 %vm553_vm3, %v667_v18 }
 0x280   : > { %2099 = vmatpush3.msra.mxu1 %v673_v8  ;;  %2100 = vmatprep.mubr.msk.f32.mxu1 %vm553_vm3, %v2811_v33  ;;  %v1042_v33 = vmul.f32 %v2842_v53, %v672_v5 }
 0x281   : > { %2106 = vmatprep.subr.mxu1 %v2544_v15  ;;  %2094 = vmatpush3.msra.mxu0 %v2777_v12 }
 0x282   : > { %2095 = vmatprep.mubr.msk.f32.mxu0 %vm2545_vm2, %v2544_v15 }
 0x283   : > { %2101 = vmatmul.mubr.msk.f32.vlgmr.msra.gmra.mrb[4].mxu1 %vm553_vm3, %v2813_v34 }
 0x284   : > { %2107 = vmatpush3.msra.mxu1 %v587_v20  ;;  %2103 = vmatprep.mubr.msk.f32.mxu1 %vm553_vm3, %v2815_v35  ;;  %v1041_v35 = vmul.f32 %v2840_v52, %v672_v5 }
 0x285   : > { %2111 = vmatprep.subr.mxu1 %v2544_v15 }
 0x287   : > { %2104 = vmatmul.mubr.msk.f32.gmra.mrb[6].mxu1 %vm553_vm3, %v2817_v36 }
 0x288   : > { %2108 = vmatprep.mubr.msk.f32.mxu1 %vm2545_vm2, %v2544_v15 }
 0x28b   : > { %2109 = vmatmul.mubr.msk.f32.vlgmr.msra.gmra.mrb[8].mxu1 %vm553_vm3, %v2805_v32 }
 0x28c   : > { %2113 = vmatprep.mubr.msk.f32.mxu1 %vm2545_vm2, %v2544_v15 }
 0x293   : > { %v1386_v26 = vpop.trf.xlu0 }
 0x297   : > { %v1387_v44 = vpop.trf.xlu0 }
 0x29b   : > { %v1388_v54 = vpop.trf.xlu0 }
 0x352   : > { %v750_v22 = vpop.f32.mrb[2].mxu1 }
 0x353   : > { %v754_v23 = vmul.f32 %v750_v22, %v2805_v32  ;;  %v2081_v24 = vpop.f32.mrb[3].mxu1  ;;  %v1514_v22 = vld [vmem:[#allocation4] sm:$0xff] }
 0x355   : > { %2096 = vmatmul.mubr.msk.f32.vlgmr.msra.gmra.mrb[4].mxu0 %vm553_vm3, %v754_v23  ;;  %v1515_v23 = vld [vmem:[#allocation4 + $0x8] sm:$0xff] }
 0x356   : > { %v2102_v27 = vpop.f32.mrb[4].mxu1  ;;  %2134 = vmatprep.mubr.msk.f32.mxu0 %vm553_vm3, %v1386_v26  ;;  %v2213_v24 = vpack.c.bf16 %v1515_v23, %v1514_v22  ;;  %v1517_v26 = vld [vmem:[#allocation4 + $0x18] sm:$0xff] }
 0x357   : > { %v1044_v29 = vadd.f32 %v2102_v27, %v1040_v25  ;;  %v1020_v30 = vpop.f32.mrb[5].mxu1  ;;  %v1516_v25 = vld [vmem:[#allocation4 + $0x10] sm:$0xff] }
 0x358   : > { %v1043_v31 = vadd.f32 %v1039_v28, %v1020_v30  ;;  %v2217_v27 = vpack.c.bf16 %v1517_v26, %v1516_v25 }
 0x359   : > { %1048 = vst.msk [vmem:[#allocation2 + $0x8] sm:$0xff] %vm553_vm3, %v1044_v29 }
 0x35a   : > { %1047 = vst.msk [vmem:[#allocation2] sm:$0xff] %vm553_vm3, %v1043_v31  ;;  %v2105_v34 = vpop.f32.mrb[6].mxu1 }
 0x35b   : > { %v1046_v36 = vadd.f32 %v2105_v34, %v1042_v33  ;;  %v1030_v37 = vpop.f32.mrb[7].mxu1  ;;  %v1720_v34 = vld [vmem:[%s3034_s6] sm:$0xff] }
 0x35c   : > { %v1045_v38 = vadd.f32 %v1041_v35, %v1030_v37  ;;  %v1721_v35 = vld [vmem:[%s3034_s6 + $0x8] sm:$0xff]  ;;  %v1722_v37 = vld [vmem:[%s3034_s6 + $0x10] sm:$0xff] }
 0x35d   : > { %1050 = vst.msk [vmem:[#allocation2 + $0x18] sm:$0xff] %vm553_vm3, %v1046_v36  ;;  %v2221_v36 = vpack.c.bf16 %v1721_v35, %v1720_v34 }
 0x35e   : > { %1049 = vst.msk [vmem:[#allocation2 + $0x10] sm:$0xff] %vm553_vm3, %v1045_v38  ;;  %v1118_v39 = vpop.f32.mrb[8].mxu1  ;;  %v1723_v38 = vld [vmem:[%s3034_s6 + $0x18] sm:$0xff] }
 0x35f   : > { %v1122_v40 = vmul.f32 1.442695, %v1118_v39  ;;  %v1124_v41 = vsub.f32 0.0, %v1118_v39  ;;  %v2110_v42 = vpop.f32.mrb[9].mxu1  ;;  %v2225_v39 = vpack.c.bf16 %v1723_v38, %v1722_v37 }
 0x360   : > { %v1135_v56 = vld [vmem:[#allocation2 + $0x8] sm:$0xff] }
 0x361   : > { %2361 = vpow2.f32 %v1122_v40  ;;  %v1125_v43 = vmul.f32 1.442695, %v1124_v41  ;;  %v1134_v55 = vld [vmem:[#allocation2] sm:$0xff] }
 0x362   : > { %2363 = vrcp.f32 %v571_v21  ;;  %v2198_v59 = vpack.c.bf16 %v1135_v56, %v1134_v55 }
 0x363   : > { %2365 = vpow2.f32 %v1125_v43 }
 0x364   : > { %v1137_v61 = vld [vmem:[#allocation2 + $0x18] sm:$0xff] }
 0x365   : > { %v1136_v60 = vld [vmem:[#allocation2 + $0x10] sm:$0xff] }
 0x366   : > { %v2202_v62 = vpack.c.bf16 %v1137_v61, %v1136_v60 }
 0x36b   : > { %v2362_v46 = vpop.eup %2361 }
 0x36c   : > { %v2364_v48 = vpop.eup %2363  ;;  %v2894_v50 = vrot.slane %v2362_v46, %v671_v2  ;;  %v1521_v2 = vld [vmem:[#allocation7 + $0x18] sm:$0xff] }
 0x36d   : > { %v2366_v49 = vpop.eup %2365  ;;  %v575_v53 = vmul.f32 %v2364_v48, %v2820_v45  ;;  %v1389_v45 = vpop.trf.xlu0 }
 0x36e   : > { %v1128_v52 = vmul.f32 %v2366_v49, %v2852_v1  ;;  %v1520_v1 = vld [vmem:[#allocation7 + $0x10] sm:$0xff]  ;;  %v1500_v7 = vmul.f32 %v1135_v56, %v2894_v50  ;;  %v1499_v10 = vmul.f32 %v1134_v55, %v2894_v50  ;;  %v1502_v17 = vmul.f32 %v1137_v61, %v2894_v50 }
 0x36f   : > { %v1127_v58 = vmul.f32 %v2362_v46, %v575_v53  ;;  %v1501_v19 = vmul.f32 %v1136_v60, %v2894_v50  ;;  %v1977_v60 = vld [vmem:[%s3033_s5] ss:$0 sm:$0xff] }
 0x370   : > { %2112 = vmatpush3.xpose.msk.msra.mxu1 %vm553_vm3, %v1128_v52  ;;  %v1133_v57 = vmul.f32 %v2894_v50, %v1128_v52 }
 0x371   : > { %2197 = vmatprep.subr.bf16.mxu1 %v2546_v47 }
 0x372   : > { %2132 = vmatprep.subr.mxu0 %v1133_v57 }
 0x373   : > { %2114 = vmatmul.mubr.msk.f32.vlgmr.msra.gmra.mrb[10].mxu1 %vm553_vm3, %v1127_v58  ;;  %2133 = vmatpush3.msra.mxu0 %v1133_v57 }
 0x374   : > { %2200 = vmatpush3.bf16.xpose.msk.msra.mxu1 %vm2833_vm4, %v2198_v59  ;;  %2135 = vmatmul.mubr.msk.f32.vlgmr.msra.gmra.mrb[6].mxu0 %vm553_vm3, %v1387_v44 }
 0x375   : > { %2137 = vmatprep.mubr.msk.f32.mxu0 %vm553_vm3, %v1388_v54  ;;  %2201 = vmatprep.subr.bf16.mxu1 %v2546_v47  ;;  %v1518_v47 = vld [vmem:[#allocation7] sm:$0xff] }
 0x376   : > { %2124 = vmatprep.mubr.msk.f32.mxu1 %vm2545_vm2, %v2544_v15  ;;  %v2205_v0 = vpack.c.bf16 %v1519_v63, %v1518_v47 }
 0x378   : > { %2138 = vmatmul.mubr.msk.f32.gmra.mrb[8].mxu0 %vm553_vm3, %v1389_v45  ;;  %2206 = vmatprep.subr.bf16.mxu0 %v2205_v0 }
 0x379   : > { %2148 = vmatprep.mubr.msk.f32.mxu0 %vm380_vm1, %v2777_v12  ;;  %2208 = vmatpush3.bf16.msra.mxu0 %v2205_v0  ;;  %v2209_v12 = vpack.c.bf16 %v1521_v2, %v1520_v1 }
 0x37b   : > { %2210 = vmatprep.subr.bf16.mxu0 %v2209_v12 }
 0x37c   : > { %2204 = vmatpush3.bf16.xpose.msk.msra.mxu1 %vm2833_vm4, %v2202_v62 }
 0x37d   : > { %2127 = vmatprep.subr.mxu1 %v2544_v15  ;;  %2212 = vmatpush3.bf16.msra.mxu0 %v2209_v12 }
 0x37e   : > { %2214 = vmatprep.subr.bf16.mxu0 %v2213_v24 }
 0x380   : > { %2149 = vmatmul.mubr.msk.f32.vlgmr.msra.gmra.mrb[10].mxu0 %vm380_vm1, %v2785_v14 }
 0x381   : > { %2216 = vmatpush3.bf16.msra.mxu0 %v2213_v24 }
 0x382   : > { %2218 = vmatprep.subr.bf16.mxu0 %v2217_v27 }
 0x383   : > { %2125 = vmatmul.mubr.msk.f32.vlgmr.msra.gmra.mrb[12].mxu1 %vm553_vm3, %v1127_v58 }
 0x384   : > { %2128 = vmatpush3.msra.mxu1 %v2785_v14  ;;  %2129 = vmatprep.mubr.msk.f32.mxu1 %vm2545_vm2, %v2544_v15 }
 0x385   : > { %2220 = vmatpush3.bf16.msra.mxu0 %v2217_v27  ;;  %2222 = vmatprep.subr.bf16.mxu1 %v2221_v36 }
 0x428   : > { %v906_v51 = vpop.f32.mrb[4].mxu0 }
 0x429   : > { %1051 = vst.msk [vmem:[#allocation3] sm:$0xff] %vm380_vm1, %v906_v51  ;;  %v2097_v3 = vpop.f32.mrb[5].mxu0 }
 0x430   : > { %v2922_v4 = vld [vmem:[#allocation3] sm:$0xff] }
 0x431   : > { %2159 = vmatprep.mubr.msk.f32.mxu0 %vm380_vm1, %v2922_v4  ;;  %v1678_v15 = vmul.f32 %v2922_v4, %v2922_v4 }
 0x433   : > { %v1680_v5 = vsel %vm380_vm1, %v1678_v15, 0.0 }
 0x434   : > { %1681 = vadd.xlane.f32.xlu1 %v1680_v5 }
 0x446   : > { %v1210_v6 = vpop.f32.mrb[10].mxu1 }
 0x447   : > { %v1214_v14 = vmul.f32 %v1210_v6, %v2805_v32  ;;  %v2115_v8 = vpop.f32.mrb[11].mxu1  ;;  %v2136_v9 = vpop.f32.mrb[6].mxu0 }
 0x448   : > { %v1504_v11 = vadd.f32 %v2136_v9, %v1500_v7  ;;  %v1480_v13 = vpop.f32.mrb[7].mxu0 }
 0x449   : > { %v1503_v16 = vadd.f32 %v1499_v10, %v1480_v13  ;;  %2130 = vmatmul.mubr.msk.f32.vlgmr.msra.gmra.mrb[12].mxu1 %vm553_vm3, %v1214_v14 }
 0x44a   : > { %1508 = vst.msk [vmem:[#allocation2 + $0x8] sm:$0xff] %vm553_vm3, %v1504_v11  ;;  %2224 = vmatpush3.bf16.msra.mxu1 %v2221_v36 }
 0x44b   : > { %1507 = vst.msk [vmem:[#allocation2] sm:$0xff] %vm553_vm3, %v1503_v16  ;;  %v2139_v18 = vpop.f32.mrb[8].mxu0  ;;  %2226 = vmatprep.subr.bf16.mxu1 %v2225_v39 }
 0x44c   : > { %v1506_v20 = vadd.f32 %v2139_v18, %v1502_v17  ;;  %v1490_v32 = vpop.f32.mrb[9].mxu0 }
 0x44d   : > { %v1505_v21 = vadd.f32 %v1501_v19, %v1490_v32 }
 0x44e   : > { %1510 = vst.msk [vmem:[#allocation2 + $0x18] sm:$0xff] %vm553_vm3, %v1506_v20  ;;  %2228 = vmatpush3.bf16.msra.mxu1 %v2225_v39 }
 0x44f   : > { %1509 = vst.msk [vmem:[#allocation2 + $0x10] sm:$0xff] %vm553_vm3, %v1505_v21 }
 0x4c1   : > { %v1682_v40 = vpop.xlane.xlu1 %1681 }
 0x4c2   : > { %v1687_v48 = vmul.f32 0.03125, %v1682_v40 }
 0x4c4   : > { %v1689_v50 = vadd.f32 1e-05, %v1687_v48 }
 0x51c   : > { %v1366_v28 = vpop.f32.mrb[12].mxu1 }
 0x51d   : > { %1511 = vst.msk [vmem:[#allocation3 + $0x8] sm:$0xff] %vm380_vm1, %v1366_v28  ;;  %v2131_v29 = vpop.f32.mrb[13].mxu1 }
 0x524   : > { %v1513_v30 = vld [vmem:[#allocation3 + $0x8] sm:$0xff] }
 0x525   : > { %2160 = vmatmul.mubr.msk.f32.vlgmr.msra.gmra.mrb[10].mxu0 %vm380_vm1, %v1513_v30  ;;  %v1679_v31 = vmul.f32 %v1513_v30, %v1513_v30 }
 0x527   : > { %v1683_v33 = vsel %vm380_vm1, %v1679_v31, 0.0 }
 0x528   : > { %1684 = vadd.xlane.f32.xlu0 %v1683_v33 }
 0x5b5   : > { %v1685_v42 = vpop.xlane.xlu0 %1684 }
 0x5b6   : > { %v1688_v49 = vmul.f32 0.03125, %v1685_v42 }
 0x5b8   : > { %v1690_v52 = vadd.f32 1e-05, %v1688_v49 }
 0x5f8   : > { %v2161_v41 = vpop.f32.mrb[10].mxu0 }
 0x5f9   : > { %v1979_v43 = vmul.f32 -1.442695, %v2161_v41  ;;  %v1669_v44 = vpop.f32.mrb[11].mxu0 }
 0x5fa   : > { %v1978_v46 = vmul.f32 -1.442695, %v1669_v44 }
 0x5fb   : > { %2367 = vpow2.f32 %v1979_v43 }
 0x5fc   : > { %2369 = vpow2.f32 %v1978_v46 }
 0x5fd   : > { %2371 = vrsqrt.f32 %v1689_v50 }
 0x5fe   : > { %2373 = vrsqrt.f32 %v1690_v52 }
 0x605   : > { %v2368_v53 = vpop.eup %2367 }
 0x606   : > { %v2370_v54 = vpop.eup %2369  ;;  %v1711_v55 = vadd.f32 1.0, %v2368_v53 }
 0x607   : > { %v1710_v56 = vadd.f32 1.0, %v2370_v54  ;;  %v2372_v57 = vpop.eup %2371 }
 0x608   : > { %2375 = vrcp.f32 %v1711_v55  ;;  %v2374_v58 = vpop.eup %2373  ;;  %v1693_v59 = vmul.f32 %v2372_v57, %v2922_v4 }
 0x609   : > { %2377 = vrcp.f32 %v1710_v56  ;;  %v1694_v45 = vmul.f32 %v2374_v58, %v1513_v30 }
 0x60a   : > { %v1702_v63 = vmul.f32 %v1977_v60, %v1693_v59 }
 0x60b   : > { %v1703_v1 = vmul.f32 %v1977_v60, %v1694_v45 }
 0x612   : > { %v2376_v61 = vpop.eup %2375 }
 0x613   : > { %v2378_v62 = vpop.eup %2377  ;;  %v1717_v47 = vmul.f32 %v2376_v61, %v2161_v41 }
 0x614   : > { %v1716_v0 = vmul.f32 %v2378_v62, %v1669_v44 }
 0x615   : > { %v1719_v12 = vmul.f32 %v1717_v47, %v1703_v1 }
 0x616   : > { %v1718_v2 = vmul.f32 %v1716_v0, %v1702_v63 }
 0x618   : > { %2170 = vmatprep.mubr.msk.f32.mxu1 %vm380_vm1, %v1718_v2 }
 0x619   : > { %2171 = vmatmul.mubr.msk.f32.vlgmr.msra.gmra.mrb[14].mxu1 %vm380_vm1, %v1719_v12 }
 0x6ec   : > { %v2172_v51 = vpop.f32.mrb[14].mxu1 }
 0x6ed   : > { %1806 = vst.msk [vmem:[%s2749_s17 + $0x8] sm:$0xff] %vm380_vm1, %v2172_v51  ;;  %v1796_v3 = vpop.f32.mrb[15].mxu1 }
 0x6ee   : > { %1805 = vst.msk [vmem:[%s2749_s17] sm:$0xff] %vm380_vm1, %v1796_v3 }
 0x6ef   : > { %2448 = shalt.err (!%p2445_p11)
}
 0x6f0   : > { %s2449_s27 = scalar_lea.hbm %s2966_s10, 256  ;;  %s2453_s15 = scalar_lea.hbm %s3036_s8, 1024 }
 0x6f1   : > { %p2450_p13 = scmp.ne.s32.totalorder %s2966_s10, %s2449_s27  ;;  %p2454_p0 = scmp.lt.u32.totalorder %s2966_s10, %s3036_s8 }
 0x6f2   : > { %p2455_p2 = scmp.lt.u32.totalorder %s2453_s15, %s2449_s27  ;;  %p2457_p12 = scmp.lt.u32.totalorder %s2449_s27, %s2966_s10 }
 0x6f3   : > { %p2451_p3 = pnand %p2450_p13, %p3065_p1 }
 0x6f4   : > { %p2456_p10 = por %p2455_p2, %p2454_p0 }
 0x6f5   : > { %p2452_p8 = pneg %p2451_p3 }
 0x6f6   : > { %p2458_p4 = por %p2457_p12, %p2456_p10 }
 0x6f8   : > { %p2459_p5 = pnand %p2458_p4, %p2452_p8 }
 0x6fa   : > { %2462 = shalt.err (!%p2459_p5)
}
 0x6fb   : > { %s2548_s21 = smov 128   ;;  %s2549_s13 = smov 8  }
 0x6fc   : > { %2243 = dma.vmem_to_hbm [thread:$0]  (%p3065_p1), %s2968_s22, 256, %s2966_s10, %s2976_s9, %s2548_s21, %s2548_s21, %s2549_s13  }
 0x6fd PF: > { %s3066_s26 = sld [smem:[#allocation13_spill]]  ;;  %s3067_s11 = sld [smem:[#allocation19_spill]] }
 0x6fe   : > { %p2260_p6 = scmp.ge.s32.totalorder %s2537_s12, 2 }
 0x703   : > { %s1838_s14 = sand.u32 1, %s3066_s26   ;;  %p3068_p7 = scmp.ne.s32.totalorder %s3067_s11, 0 }
 0x704   : > { %s1839_s29 = scalar_lea.sflag [#allocation6], %s1838_s14 }
 0x705   : > { %p2253_p9 = pnand %p2260_p6, %p3068_p7 }
 0x707   : > { %2504 = dma.done.wait (!%p2253_p9), %s1839_s29, 256  }
 0x708   : > { %2506 = vsyncadd (!%p2253_p9), %s1839_s29, 4294967040  ;;  %s23_s12 = sadd.s32 1, %s2537_s12   ;;  %s3069_s20 = sld [smem:[#allocation14_spill]] }
 0x709   : > { %p20_p11 = scmp.ge.s32.totalorder %s23_s12, 6   ;;  %s3070_s29 = sld [smem:[#allocation20_spill]] }
 0x70a   : > { %s3071_s30 = sld [smem:[#allocation15_spill]]  ;;  %s3072_s9 = sld [smem:[#allocation16_spill]] }
 0x70b   : > { %s3073_s10 = sld [smem:[#allocation17_spill]]  ;;  %s3074_s11 = sld [smem:[#allocation18_spill]] }
 0x70c   : > { %s3075_s27 = smov %s2513_s28  ;;  %22 = sbr.rel (!%p20_p11) target bundleno = 7 (0x7), region = 100 }
 0x70e   : > { %s3076_s28 = smov %s3069_s20 }
 0x713   :  { %1844 = vsyncpa [#allocation5], 1 }
 0x714   :  { %1846 = vsyncpa [#allocation5 + $0x1], 1 }
 0x715   :  { %1847 = vsyncpa [#allocation8], 1 }
 0x716   :  { %1848 = vsyncpa [#allocation6], 1 }
 0x717   :  { %1850 = vsyncpa [#allocation6 + $0x1], 1 }

</bundles_post_ra>
